<compile_context>
chip_gen: v7x
topology: tpu7x:2x2x1
jax: 0.10.0
libtpu: 0.0.40
codegen_flags: <defaults>
</compile_context>

<pallas_src>
import functools

import jax
import jax.numpy as jnp
from jax.experimental import pallas as pl
from jax.experimental.pallas import tpu as pltpu


def _ceil_to(x, m):
    return ((x + m - 1) // m) * m


def _projector_kernel(x_ref, w1_ref, b1_ref, w2_ref, b2_ref, o_ref, acc_ref):
    k = pl.program_id(1)

    @pl.when(k == 0)
    def _init():
        acc_ref[...] = jnp.zeros_like(acc_ref)

    # linear1 partial product, accumulated in f32 (bf16 x bf16 -> f32 on MXU).
    acc_ref[...] += jnp.dot(x_ref[...], w1_ref[...],
                            preferred_element_type=jnp.float32)

    @pl.when(k == pl.num_programs(1) - 1)
    def _finalize():
        h = acc_ref[...] + b1_ref[...]           # bias in f32, once
        h = h * jax.nn.sigmoid(h)                # SiLU in f32 (EUP exp + VPU)
        y = jnp.dot(h.astype(w2_ref.dtype), w2_ref[...],
                    preferred_element_type=jnp.float32)
        o_ref[...] = (y + b2_ref[...]).astype(o_ref.dtype)


def multimodal_projector(image_embeds, w1, b1, w2, b2, *, tm_max=256, tk_max=512):
    """image_embeds: (..., vision_hidden*9).

    w1: (vision_hidden*9, text_hidden)   b1: (text_hidden,)
    w2: (text_hidden,    text_hidden)    b2: (text_hidden,)
    Weights are (in_features, out_features) so the kernel is plain x @ W + b
    (same semantics as nn.Linear's x @ W^T + b).
    """
    orig_shape = image_embeds.shape
    K = orig_shape[-1]
    T = w1.shape[1]
    out_dtype = image_embeds.dtype

    x2d = image_embeds.reshape(-1, K)
    M = x2d.shape[0]

    # --- tile sizes & padded extents -------------------------------------
    # tm = 256 feeds the 256x256 MXU on v6e/v7x; harmless on v5e since the
    # VMEM budget is set explicitly below.  tk streams W1 along K.
    Tp = _ceil_to(T, 128)                        # lane-dense output features
    tk = min(tk_max, _ceil_to(K, 128))
    Kp = _ceil_to(K, tk)
    tm = min(tm_max, _ceil_to(M, 8))
    Mp = _ceil_to(M, tm)

    # --- zero-pad + cast to bf16 for the MXU (exact: padded rows/cols of
    # zeros contribute nothing; padded output cols are sliced off) ---------
    xp = jnp.pad(x2d.astype(jnp.bfloat16), ((0, Mp - M), (0, Kp - K)))
    w1p = jnp.pad(w1.astype(jnp.bfloat16), ((0, Kp - K), (0, Tp - T)))
    w2p = jnp.pad(w2.astype(jnp.bfloat16), ((0, Tp - T), (0, Tp - T)))
    b1p = jnp.pad(b1.astype(jnp.float32), (0, Tp - T)).reshape(1, Tp)
    b2p = jnp.pad(b2.astype(jnp.float32), (0, Tp - T)).reshape(1, Tp)

    # --- explicit VMEM budget (double-buffered tiles + resident weights) --
    out_bytes = jnp.dtype(out_dtype).itemsize
    need = (2 * tm * tk * 2            # x tile (bf16, double-buffered)
            + 2 * tk * Tp * 2          # W1 tile (bf16, double-buffered)
            + 2 * Tp * Tp * 2          # W2 resident (bf16)
            + 4 * Tp * 4               # biases (f32)
            + 2 * tm * Tp * out_bytes  # output tile (double-buffered)
            + tm * Tp * 4)             # f32 accumulator scratch
    vmem_limit = int(min(max(2 * need, 32 * 1024 * 1024), 64 * 1024 * 1024))

    out = pl.pallas_call(
        _projector_kernel,
        out_shape=jax.ShapeDtypeStruct((Mp, Tp), out_dtype),
        grid_spec=pltpu.PrefetchScalarGridSpec(
            num_scalar_prefetch=0,
            grid=(Mp // tm, Kp // tk),
            in_specs=[
                pl.BlockSpec((tm, tk), lambda i, k: (i, k)),   # x: M & K tiled
                pl.BlockSpec((tk, Tp), lambda i, k: (k, 0)),   # W1: K-streamed
                pl.BlockSpec((1, Tp), lambda i, k: (0, 0)),    # b1: resident
                pl.BlockSpec((Tp, Tp), lambda i, k: (0, 0)),   # W2: resident
                pl.BlockSpec((1, Tp), lambda i, k: (0, 0)),    # b2: resident
            ],
            out_specs=pl.BlockSpec((tm, Tp), lambda i, k: (i, 0)),
            scratch_shapes=[pltpu.VMEM((tm, Tp), jnp.float32)],
        ),
        compiler_params=pltpu.CompilerParams(
            dimension_semantics=("parallel", "arbitrary"),
            vmem_limit_bytes=vmem_limit,
        ),
    )(xp, w1p, b1p, w2p, b2p)

    return out[:M, :T].reshape(*orig_shape[:-1], T)


def _reference(image_embeds, w1, b1, w2, b2):
    # Matches the kernel's numerics: bf16 inputs/weights, f32 accumulation,
    # f32 bias + SiLU, bf16 intermediate into the second matmul.
    xb = image_embeds.astype(jnp.bfloat16)
    w1b = w1.astype(jnp.bfloat16)
    w2b = w2.astype(jnp.bfloat16)
    h = jnp.einsum("...k,kt->...t", xb, w1b,
                   preferred_element_type=jnp.float32) + b1.astype(jnp.float32)
    h = h * jax.nn.sigmoid(h)
    y = jnp.einsum("...t,tu->...u", h.astype(jnp.bfloat16), w2b,
                   preferred_element_type=jnp.float32) + b2.astype(jnp.float32)
    return y.astype(image_embeds.dtype)


if __name__ == "__main__":
    vision_hidden = 32
    text_hidden = 32
    batch, seq = 2, 8
    K = vision_hidden * 9      # 288

    key = jax.random.PRNGKey(0)
    k_x, k_w1, k_b1, k_w2, k_b2 = jax.random.split(key, 5)

    # Deterministic synthetic params (shapes implied by nn.Linear in __init__).
    x = jax.random.normal(k_x, (batch, seq, K), dtype=jnp.float32)
    w1 = (jax.random.normal(k_w1, (K, text_hidden), dtype=jnp.float32)
          * (1.0 / jnp.sqrt(K)))
    b1 = jax.random.normal(k_b1, (text_hidden,), dtype=jnp.float32) * 0.01
    w2 = (jax.random.normal(k_w2, (text_hidden, text_hidden), dtype=jnp.float32)
          * (1.0 / jnp.sqrt(text_hidden)))
    b2 = jax.random.normal(k_b2, (text_hidden,), dtype=jnp.float32) * 0.01

    run = jax.jit(multimodal_projector)
    y = run(x, w1, b1, w2, b2)
    y = jax.block_until_ready(y)

    y_ref = _reference(x, w1, b1, w2, b2)
    assert y.shape == (batch, seq, text_hidden)
    assert jnp.allclose(y, y_ref, atol=1e-2, rtol=1e-2), "mismatch vs reference"

    print("KERNEL_OK")
</pallas_src>

<mosaic_0001>
module attributes {stable_mosaic.version = 11 : i64} {
  func.func @_projector_kernel(%arg0: i32, %arg1: i32, %arg2: memref<16x384xbf16, #tpu.memory_space<vmem>>, %arg3: memref<384x128xbf16, #tpu.memory_space<vmem>>, %arg4: memref<1x128xf32, #tpu.memory_space<vmem>>, %arg5: memref<128x128xbf16, #tpu.memory_space<vmem>>, %arg6: memref<1x128xf32, #tpu.memory_space<vmem>>, %arg7: memref<16x128xf32, #tpu.memory_space<vmem>>, %arg8: memref<16x128xf32, #tpu.memory_space<vmem>>) attributes {dimension_semantics = [#tpu.dimension_semantics<parallel>, #tpu.dimension_semantics<arbitrary>], iteration_bounds = array<i64: 1, 1>, scalar_prefetch = 0 : i64, scratch_operands = 1 : i64, tpu.core_type = #tpu.core_type<tc>, window_params = [{transform_indices = @transform_0, window_bounds = array<i64: 16, 384>}, {transform_indices = @transform_1, window_bounds = array<i64: 384, 128>}, {pipeline_mode = #tpu.pipeline_mode<synchronous>, transform_indices = @transform_2, window_bounds = array<i64: 1, 128>}, {pipeline_mode = #tpu.pipeline_mode<synchronous>, transform_indices = @transform_3, window_bounds = array<i64: 128, 128>}, {pipeline_mode = #tpu.pipeline_mode<synchronous>, transform_indices = @transform_4, window_bounds = array<i64: 1, 128>}, {transform_indices = @transform_5, window_bounds = array<i64: 16, 128>}]} {
    %c0_i32 = arith.constant 0 : i32
    %0 = arith.cmpi eq, %arg1, %c0_i32 : i32
    %1 = arith.extui %0 : i1 to i32
    %c0_i32_0 = arith.constant 0 : i32
    %2 = arith.cmpi ne, %1, %c0_i32_0 : i32
    scf.if %2 {
      %cst_10 = arith.constant 0.000000e+00 : f32
      %12 = vector.broadcast %cst_10 : f32 to vector<16x128xf32>
      %c0_11 = arith.constant 0 : index
      %c0_12 = arith.constant 0 : index
      %13 = vector.load %arg8[%c0_11, %c0_12] : memref<16x128xf32, #tpu.memory_space<vmem>>, vector<16x128xf32>
      tpu.vector_store %arg8[%c0_11, %c0_12], %12 {strides = array<i32>} : memref<16x128xf32, #tpu.memory_space<vmem>>, vector<16x128xf32>,
    } else {
    }
    %c0 = arith.constant 0 : index
    %c0_1 = arith.constant 0 : index
    %3 = vector.load %arg8[%c0, %c0_1] : memref<16x128xf32, #tpu.memory_space<vmem>>, vector<16x128xf32>
    %c0_2 = arith.constant 0 : index
    %c0_3 = arith.constant 0 : index
    %4 = vector.load %arg2[%c0_2, %c0_3] : memref<16x384xbf16, #tpu.memory_space<vmem>>, vector<16x384xbf16>
    %c0_4 = arith.constant 0 : index
    %c0_5 = arith.constant 0 : index
    %5 = vector.load %arg3[%c0_4, %c0_5] : memref<384x128xbf16, #tpu.memory_space<vmem>>, vector<384x128xbf16>
    %cst = arith.constant dense<0.000000e+00> : vector<16x128xf32>
    %6 = tpu.matmul %4, %5, %cst {dimension_numbers = #tpu.dot_dimension_numbers<[1], [0], [0], [1], [0, 0, 1, 1], [], []>} : vector<16x384xbf16>, vector<384x128xbf16>, vector<16x128xf32> -> vector<16x128xf32>
    %7 = arith.addf %3, %6 : vector<16x128xf32>
    %c0_6 = arith.constant 0 : index
    %c0_7 = arith.constant 0 : index
    %8 = vector.load %arg8[%c0_6, %c0_7] : memref<16x128xf32, #tpu.memory_space<vmem>>, vector<16x128xf32>
    tpu.vector_store %arg8[%c0_6, %c0_7], %7 {strides = array<i32>} : memref<16x128xf32, #tpu.memory_space<vmem>>, vector<16x128xf32>,
    %c0_i32_8 = arith.constant 0 : i32
    %9 = arith.cmpi eq, %arg1, %c0_i32_8 : i32
    %10 = arith.extui %9 : i1 to i32
    %c0_i32_9 = arith.constant 0 : i32
    %11 = arith.cmpi ne, %10, %c0_i32_9 : i32
    scf.if %11 {
      %c0_10 = arith.constant 0 : index
      %c0_11 = arith.constant 0 : index
      %12 = vector.load %arg8[%c0_10, %c0_11] : memref<16x128xf32, #tpu.memory_space<vmem>>, vector<16x128xf32>
      %c0_12 = arith.constant 0 : index
      %c0_13 = arith.constant 0 : index
      %13 = vector.load %arg4[%c0_12, %c0_13] : memref<1x128xf32, #tpu.memory_space<vmem>>, vector<1x128xf32>
      %14 = vector.broadcast %13 : vector<1x128xf32> to vector<16x128xf32>
      %15 = arith.addf %12, %14 : vector<16x128xf32>
      %16 = arith.negf %15 : vector<16x128xf32>
      %17 = math.exp %16 : vector<16x128xf32>
      %cst_14 = arith.constant 1.000000e+00 : f32
      %18 = vector.broadcast %cst_14 : f32 to vector<16x128xf32>
      %19 = arith.addf %18, %17 : vector<16x128xf32>
      %20 = arith.divf %18, %19 : vector<16x128xf32>
      %21 = arith.mulf %15, %20 : vector<16x128xf32>
      %22 = arith.truncf %21 : vector<16x128xf32> to vector<16x128xbf16>
      %c0_15 = arith.constant 0 : index
      %c0_16 = arith.constant 0 : index
      %23 = vector.load %arg5[%c0_15, %c0_16] : memref<128x128xbf16, #tpu.memory_space<vmem>>, vector<128x128xbf16>
      %cst_17 = arith.constant dense<0.000000e+00> : vector<16x128xf32>
      %24 = tpu.matmul %22, %23, %cst_17 {dimension_numbers = #tpu.dot_dimension_numbers<[1], [0], [0], [1], [0, 0, 1, 1], [], []>} : vector<16x128xbf16>, vector<128x128xbf16>, vector<16x128xf32> -> vector<16x128xf32>
      %c0_18 = arith.constant 0 : index
      %c0_19 = arith.constant 0 : index
      %25 = vector.load %arg6[%c0_18, %c0_19] : memref<1x128xf32, #tpu.memory_space<vmem>>, vector<1x128xf32>
      %26 = vector.broadcast %25 : vector<1x128xf32> to vector<16x128xf32>
      %27 = arith.addf %24, %26 : vector<16x128xf32>
      %c0_20 = arith.constant 0 : index
      %c0_21 = arith.constant 0 : index
      %28 = vector.load %arg7[%c0_20, %c0_21] : memref<16x128xf32, #tpu.memory_space<vmem>>, vector<16x128xf32>
      tpu.vector_store %arg7[%c0_20, %c0_21], %27 {strides = array<i32>} : memref<16x128xf32, #tpu.memory_space<vmem>>, vector<16x128xf32>,
    } else {
    }
    return
  }
  func.func @transform_0(%arg0: i32, %arg1: i32) -> (i32, i32) {
    %c0_i32 = arith.constant 0 : i32
    return %arg0, %arg1 : i32, i32
  }
  func.func @transform_1(%arg0: i32, %arg1: i32) -> (i32, i32) {
    %c0_i32 = arith.constant 0 : i32
    %c0_i32_0 = arith.constant 0 : i32
    return %arg1, %c0_i32 : i32, i32
  }
  func.func @transform_2(%arg0: i32, %arg1: i32) -> (i32, i32) {
    %c0_i32 = arith.constant 0 : i32
    %c0_i32_0 = arith.constant 0 : i32
    %c0_i32_1 = arith.constant 0 : i32
    return %c0_i32, %c0_i32_0 : i32, i32
  }
  func.func @transform_3(%arg0: i32, %arg1: i32) -> (i32, i32) {
    %c0_i32 = arith.constant 0 : i32
    %c0_i32_0 = arith.constant 0 : i32
    %c0_i32_1 = arith.constant 0 : i32
    return %c0_i32, %c0_i32_0 : i32, i32
  }
  func.func @transform_4(%arg0: i32, %arg1: i32) -> (i32, i32) {
    %c0_i32 = arith.constant 0 : i32
    %c0_i32_0 = arith.constant 0 : i32
    %c0_i32_1 = arith.constant 0 : i32
    return %c0_i32, %c0_i32_0 : i32, i32
  }
  func.func @transform_5(%arg0: i32, %arg1: i32) -> (i32, i32) {
    %c0_i32 = arith.constant 0 : i32
    %c0_i32_0 = arith.constant 0 : i32
    return %arg0, %c0_i32 : i32, i32
  }
}

</mosaic_0001>

<bundles_post_ra>
// kernel: multimodal_projector.1
= control target key start
LH: loop header
LB: loop body
LE: loop exit
PB: predicated region body
PF: predicated region fallthrough
CT: control target
= control target key end

     0   :  { %v639_v1 = vmov 0.0   ;;  %vm640_vm0 = vmmov 0   ;;  %s808_s1 = inlined_call_operand.vmem [shape: bf16[384,128], index: 1, kind: input, shape index: {}]   ;;  %s809_s0 = inlined_call_operand.vmem [shape: bf16[16,384], index: 0, kind: input, shape index: {}]   ;;  %s810_s3 = inlined_call_operand.vmem [shape: bf16[128,128], index: 3, kind: input, shape index: {}]   ;;  %s811_s2 = inlined_call_operand.vmem [shape: f32[1,128], index: 2, kind: input, shape index: {}]   ;;  %s812_s4 = inlined_call_operand.vmem [shape: f32[1,128], index: 4, kind: input, shape index: {}]   ;;  %s813_s5 = inlined_call_operand.vmem [shape: f32[16,128], index: 5, kind: output, shape index: {}]  }
   0x1   :  { %v595_v0 = vld [vmem:[%s808_s1 + $0x40] sm:$0xff]   ;;  %553 = vmatprep.subr.bf16.mxu1 %v639_v1  ;;  %569 = vmatprep.mubr.msk.bf16.mxu1 %vm640_vm0, %v639_v1  ;;  %v598_v4 = vld [vmem:[%s808_s1 + $0x48] sm:$0xff]   ;;  %v601_v7 = vld [vmem:[%s808_s1 + $0x50] sm:$0xff]  }
   0x2   :  { %v596_v2 = vld [vmem:[%s808_s1] sm:$0xff]   ;;  %513 = vmatprep.subr.bf16.mxu0 %v595_v0  ;;  %v599_v5 = vld [vmem:[%s808_s1 + $0x8] sm:$0xff]   ;;  %v602_v8 = vld [vmem:[%s808_s1 + $0x10] sm:$0xff]  }
   0x3   :  { %v597_v3 = vld [vmem:[%s808_s1 + $0x80] sm:$0xff]   ;;  %514 = vmatpush3.bf16.msra.mxu0 %v596_v2  ;;  %v600_v6 = vld [vmem:[%s808_s1 + $0x88] sm:$0xff]   ;;  %v603_v9 = vld [vmem:[%s808_s1 + $0x90] sm:$0xff]  }
   0x4   :  { %554 = vmatpush3.bf16.msra.mxu1 %v597_v3  ;;  %515 = vmatprep.subr.bf16.mxu0 %v598_v4  ;;  %v604_v10 = vld [vmem:[%s808_s1 + $0x58] sm:$0xff]   ;;  %v607_v13 = vld [vmem:[%s808_s1 + $0x60] sm:$0xff]   ;;  %v610_v16 = vld [vmem:[%s808_s1 + $0x68] sm:$0xff]  }
   0x5   :  { %555 = vmatprep.subr.bf16.mxu1 %v639_v1  ;;  %v605_v11 = vld [vmem:[%s808_s1 + $0x18] sm:$0xff]   ;;  %v608_v14 = vld [vmem:[%s808_s1 + $0x20] sm:$0xff]   ;;  %v611_v17 = vld [vmem:[%s808_s1 + $0x28] sm:$0xff]  }
   0x6   :  { %v606_v12 = vld [vmem:[%s808_s1 + $0x98] sm:$0xff]   ;;  %v609_v15 = vld [vmem:[%s808_s1 + $0xa0] sm:$0xff]   ;;  %v612_v18 = vld [vmem:[%s808_s1 + $0xa8] sm:$0xff]  }
   0x7   :  { %516 = vmatpush3.bf16.msra.mxu0 %v599_v5  ;;  %v613_v19 = vld [vmem:[%s808_s1 + $0x70] sm:$0xff]   ;;  %v616_v22 = vld [vmem:[%s808_s1 + $0x78] sm:$0xff]   ;;  %v619_v26 = vld [vmem:[%s809_s0] ss:$12 sps:$4 sm:$0xff]  }
   0x8   :  { %556 = vmatpush3.bf16.msra.mxu1 %v600_v6  ;;  %517 = vmatprep.subr.bf16.mxu0 %v601_v7  ;;  %v614_v20 = vld [vmem:[%s808_s1 + $0x30] sm:$0xff]   ;;  %v617_v24 = vld [vmem:[%s808_s1 + $0x38] sm:$0xff]   ;;  %v623_v28 = vld [vmem:[%s810_s3] sm:$0xff]  }
   0x9   :  { %557 = vmatprep.subr.bf16.mxu1 %v639_v1  ;;  %v615_v21 = vld [vmem:[%s808_s1 + $0xb0] sm:$0xff]   ;;  %v618_v25 = vld [vmem:[%s808_s1 + $0xb8] sm:$0xff]   ;;  %v624_v29 = vld [vmem:[%s810_s3 + $0x8] sm:$0xff]  }
   0xa   :  { %v621_v23 = vld [vmem:[%s809_s0 + $0x4] ss:$12 sps:$4 sm:$0xff]   ;;  %v622_v27 = vld [vmem:[%s809_s0 + $0x8] ss:$12 sps:$4 sm:$0xff]   ;;  %v626_v31 = vld [vmem:[%s810_s3 + $0x18] sm:$0xff]  }
   0xb   :  { %518 = vmatpush3.bf16.msra.mxu0 %v602_v8  ;;  %273 = vmatprep.mubr.bf16.mxu0 %v621_v23  ;;  %v625_v30 = vld [vmem:[%s810_s3 + $0x10] sm:$0xff]   ;;  %v627_v32 = vld [vmem:[%s810_s3 + $0x20] sm:$0xff]   ;;  %v628_v33 = vld [vmem:[%s810_s3 + $0x28] sm:$0xff]  }
   0xc   :  { %558 = vmatpush3.bf16.msra.mxu1 %v603_v9  ;;  %519 = vmatprep.subr.bf16.mxu0 %v604_v10  ;;  %v629_v34 = vld [vmem:[%s810_s3 + $0x30] sm:$0xff]   ;;  %v630_v35 = vld [vmem:[%s810_s3 + $0x38] sm:$0xff]   ;;  %v501_v42 = vld [vmem:[%s811_s2] ss:$0 sm:$0xff] }
   0xd   :  { %559 = vmatprep.subr.bf16.mxu1 %v639_v1  ;;  %v504_v62 = vld [vmem:[%s812_s4] ss:$0 sm:$0xff] }
   0xf   :  { %520 = vmatpush3.bf16.msra.mxu0 %v605_v11 }
  0x10   :  { %560 = vmatpush3.bf16.msra.mxu1 %v606_v12  ;;  %521 = vmatprep.subr.bf16.mxu0 %v607_v13 }
  0x11   :  { %561 = vmatprep.subr.bf16.mxu1 %v639_v1 }
  0x13   :  { %522 = vmatpush3.bf16.msra.mxu0 %v608_v14 }
  0x14   :  { %562 = vmatpush3.bf16.msra.mxu1 %v609_v15  ;;  %523 = vmatprep.subr.bf16.mxu0 %v610_v16 }
  0x15   :  { %563 = vmatprep.subr.bf16.mxu1 %v639_v1 }
  0x17   :  { %524 = vmatpush3.bf16.msra.mxu0 %v611_v17 }
  0x18   :  { %564 = vmatpush3.bf16.msra.mxu1 %v612_v18  ;;  %525 = vmatprep.subr.bf16.mxu0 %v613_v19 }
  0x19   :  { %565 = vmatprep.subr.bf16.mxu1 %v639_v1 }
  0x1b   :  { %526 = vmatpush3.bf16.msra.mxu0 %v614_v20 }
  0x1c   :  { %566 = vmatpush3.bf16.msra.mxu1 %v615_v21  ;;  %527 = vmatprep.subr.bf16.mxu0 %v616_v22 }
  0x1d   :  { %567 = vmatprep.subr.bf16.mxu1 %v639_v1 }
  0x1f   :  { %528 = vmatpush3.bf16.msra.mxu0 %v617_v24 }
  0x20   :  { %568 = vmatpush3.bf16.msra.mxu1 %v618_v25  ;;  %573 = vmatprep.subr.bf16.mxu0 %v639_v1 }
  0x22   :  { %274 = vmatmul.mubr.bf16.vlgmr.msra.gmra.mrb[0].mxu0 %v619_v26 }
  0x23   :  { %570 = vmatmul.mubr.bf16.vlgmr.msra.gmra.mrb[0].mxu1 %v622_v27  ;;  %589 = vmatprep.mubr.msk.bf16.mxu0 %vm640_vm0, %v639_v1 }
  0x24   :  { %574 = vmatpush3.bf16.msra.mxu0 %v623_v28 }
  0x25   :  { %575 = vmatprep.subr.bf16.mxu0 %v639_v1 }
  0x28   :  { %576 = vmatpush3.bf16.msra.mxu0 %v624_v29 }
  0x29   :  { %577 = vmatprep.subr.bf16.mxu0 %v639_v1 }
  0x2c   :  { %578 = vmatpush3.bf16.msra.mxu0 %v625_v30 }
  0x2d   :  { %579 = vmatprep.subr.bf16.mxu0 %v639_v1 }
  0x30   :  { %580 = vmatpush3.bf16.msra.mxu0 %v626_v31 }
  0x31   :  { %581 = vmatprep.subr.bf16.mxu0 %v639_v1 }
  0x34   :  { %582 = vmatpush3.bf16.msra.mxu0 %v627_v32 }
  0x35   :  { %583 = vmatprep.subr.bf16.mxu0 %v639_v1 }
  0x38   :  { %584 = vmatpush3.bf16.msra.mxu0 %v628_v33 }
  0x39   :  { %585 = vmatprep.subr.bf16.mxu0 %v639_v1 }
  0x3c   :  { %586 = vmatpush3.bf16.msra.mxu0 %v629_v34 }
  0x3d   :  { %587 = vmatprep.subr.bf16.mxu0 %v639_v1 }
  0x40   :  { %588 = vmatpush3.bf16.msra.mxu0 %v630_v35 }
  0xf5   :  { %v529_v36 = vpop.f32.mrb[0].mxu0 }
  0xf6   :  { %v316_v37 = vpop.f32.mrb[0].mxu1  ;;  %v530_v38 = vpop.f32.mrb[1].mxu0 }
  0xf7   :  { %v531_v39 = vadd.f32 %v530_v38, %v529_v36  ;;  %v571_v40 = vpop.f32.mrb[1].mxu1  ;;  %v532_v41 = vpop.f32.mrb[2].mxu0 }
  0xf8   :  { %v319_v43 = vpop.f32.mrb[2].mxu1  ;;  %v533_v44 = vpop.f32.mrb[3].mxu0 }
  0xf9   :  { %v317_v45 = vadd.f32 %v531_v39, %v316_v37  ;;  %v534_v46 = vadd.f32 %v533_v44, %v532_v41  ;;  %v572_v47 = vpop.f32.mrb[3].mxu1 }
  0xfb   :  { %v339_v48 = vadd.f32 %v501_v42, %v317_v45  ;;  %v320_v49 = vadd.f32 %v534_v46, %v319_v43 }
  0xfd   :  { %v502_v50 = vmul.f32 -1.442695, %v339_v48  ;;  %v340_v51 = vadd.f32 %v501_v42, %v320_v49 }
  0xff   :  { %631 = vpow2.f32 %v502_v50  ;;  %v503_v52 = vmul.f32 -1.442695, %v340_v51 }
 0x101   :  { %633 = vpow2.f32 %v503_v52 }
 0x109   :  { %v632_v53 = vpop.eup %631 }
 0x10a   :  { %v347_v54 = vadd.f32 1.0, %v632_v53 }
 0x10b   :  { %v634_v55 = vpop.eup %633 }
 0x10c   :  { %635 = vrcp.f32 %v347_v54  ;;  %v348_v56 = vadd.f32 1.0, %v634_v55 }
 0x10e   :  { %637 = vrcp.f32 %v348_v56 }
 0x116   :  { %v636_v57 = vpop.eup %635 }
 0x117   :  { %v353_v59 = vmul.f32 %v636_v57, %v339_v48 }
 0x118   :  { %v638_v58 = vpop.eup %637 }
 0x119   :  { %v354_v60 = vmul.f32 %v638_v58, %v340_v51 }
 0x11b   :  { %v355_v61 = vpack.c.bf16 %v354_v60, %v353_v59 }
 0x11d   :  { %590 = vmatmul.mubr.bf16.vlgmr.msra.gmra.mrb[4].mxu0 %v355_v61 }
 0x1f0   :  { %v461_v63 = vpop.f32.mrb[4].mxu0 }
 0x1f1   :  { %v462_v0 = vadd.f32 %v504_v62, %v461_v63  ;;  %v591_v1 = vpop.f32.mrb[5].mxu0 }
 0x1f2   :  { %v464_v2 = vpop.f32.mrb[6].mxu0 }
 0x1f3   :  { %468 = vst [vmem:[%s813_s5] sm:$0xff] %v462_v0  ;;  %v465_v3 = vadd.f32 %v504_v62, %v464_v2  ;;  %v592_v4 = vpop.f32.mrb[7].mxu0 }
 0x1f5   :  { %469 = vst [vmem:[%s813_s5 + $0x8] sm:$0xff] %v465_v3 }

</bundles_post_ra>
